<compile_context>
chip_gen: v5e
topology: v5e:2x2
jax: 0.10.0
libtpu: 0.0.40
codegen_flags: <defaults>
</compile_context>

<pallas_src>
import functools

import jax
import jax.numpy as jnp
import numpy as np
from jax.experimental import pallas as pl
from jax.experimental.pallas import tpu as pltpu

HID1 = 20    # fc1 output
HID2 = 50    # LSTM hidden size
LANE = 128   # TPU lane width
SUB = 8      # f32 sublane height
HP = LANE    # padded hidden width


def _round_up(x, m):
    return (x + m - 1) // m * m


# ----------------------------------------------------------------------------
# Kernel: one grid step == one timestep of the recurrent Actor.
# ----------------------------------------------------------------------------
def actor_seq_kernel(x_ref, hx0_ref, cx0_ref,
                     w1_ref, b1_ref, w2_ref, b2_ref,
                     wl_ref, bl_ref, w3_ref, b3_ref,
                     y_ref, hxo_ref, cxo_ref,
                     z_ref, c_ref):
    t = pl.program_id(0)

    # Load initial recurrent state into the resident VMEM scratch once.
    @pl.when(t == 0)
    def _init():
        z_ref[:, HP:2 * HP] = hx0_ref[...]   # h lives in the second 128-lane block
        c_ref[...] = cx0_ref[...]

    x = x_ref[0]                             # (Bp, Sp)

    # fc1 + relu
    h1 = jnp.maximum(
        jnp.dot(x, w1_ref[...], preferred_element_type=jnp.float32) + b1_ref[...],
        0.0)

    # fc2 + relu
    h2 = jnp.maximum(
        jnp.dot(h1, w2_ref[...], preferred_element_type=jnp.float32) + b2_ref[...],
        0.0)

    # LSTMCell with fused input/hidden weights:
    #   z = [h2 | h_prev]  (Bp, 256);  gates = z @ W_lstm + (b_ih + b_hh)
    z_ref[:, 0:HP] = h2
    gates = (jnp.dot(z_ref[...], wl_ref[...], preferred_element_type=jnp.float32)
             + bl_ref[...])

    # Each gate occupies its own 128-lane block -> whole-vreg slices.
    i_g = jax.nn.sigmoid(gates[:, 0 * HP:1 * HP])
    f_g = jax.nn.sigmoid(gates[:, 1 * HP:2 * HP])
    g_g = jnp.tanh(gates[:, 2 * HP:3 * HP])
    o_g = jax.nn.sigmoid(gates[:, 3 * HP:4 * HP])

    c_new = f_g * c_ref[...] + i_g * g_g
    h_new = o_g * jnp.tanh(c_new)

    # Carry state for the next grid step.
    c_ref[...] = c_new
    z_ref[:, HP:2 * HP] = h_new

    # fc3 + tanh -> per-step output (lane-dense, unmasked store)
    y_ref[0] = jnp.tanh(
        jnp.dot(h_new, w3_ref[...], preferred_element_type=jnp.float32) + b3_ref[...])

    # Emit final recurrent state on the last step.
    @pl.when(t == pl.num_programs(0) - 1)
    def _final():
        hxo_ref[...] = h_new
        cxo_ref[...] = c_new


# ----------------------------------------------------------------------------
# Wrapper: pads to TPU-friendly shapes and folds the time loop into the grid.
# ----------------------------------------------------------------------------
def actor_forward_seq(xs, hx, cx, packed, nb_actions):
    """xs: (T, B, nb_states) f32; hx/cx: (B, 50) f32.
    Returns (ys (T, B, nb_actions), (hx_new, cx_new))."""
    T, B, S = xs.shape
    Sp = packed["w1"].shape[0]
    Ap = packed["w3"].shape[1]
    Bp = _round_up(max(B, SUB), SUB)

    xs_p = jnp.zeros((T, Bp, Sp), jnp.float32).at[:, :B, :S].set(xs)
    hx_p = jnp.zeros((Bp, HP), jnp.float32).at[:B, :HID2].set(hx)
    cx_p = jnp.zeros((Bp, HP), jnp.float32).at[:B, :HID2].set(cx)

    const = lambda t: (0, 0)                 # weights / state: resident in VMEM

    ys, hxo, cxo = pl.pallas_call(
        actor_seq_kernel,
        out_shape=(
            jax.ShapeDtypeStruct((T, Bp, Ap), jnp.float32),
            jax.ShapeDtypeStruct((Bp, HP), jnp.float32),
            jax.ShapeDtypeStruct((Bp, HP), jnp.float32),
        ),
        grid_spec=pltpu.PrefetchScalarGridSpec(
            num_scalar_prefetch=0,
            grid=(T,),
            in_specs=[
                pl.BlockSpec((1, Bp, Sp), lambda t: (t, 0, 0)),   # x_t
                pl.BlockSpec((Bp, HP), const),                    # hx0
                pl.BlockSpec((Bp, HP), const),                    # cx0
                pl.BlockSpec((Sp, HP), const),                    # w1
                pl.BlockSpec((1, HP), const),                     # b1
                pl.BlockSpec((HP, HP), const),                    # w2
                pl.BlockSpec((1, HP), const),                     # b2
                pl.BlockSpec((2 * HP, 4 * HP), const),            # fused W_lstm
                pl.BlockSpec((1, 4 * HP), const),                 # fused b_lstm
                pl.BlockSpec((HP, Ap), const),                    # w3
                pl.BlockSpec((1, Ap), const),                     # b3
            ],
            out_specs=[
                pl.BlockSpec((1, Bp, Ap), lambda t: (t, 0, 0)),   # per-step action
                pl.BlockSpec((Bp, HP), const),                    # final h
                pl.BlockSpec((Bp, HP), const),                    # final c
            ],
            scratch_shapes=[
                pltpu.VMEM((Bp, 2 * HP), jnp.float32),            # [h2 | h_prev]
                pltpu.VMEM((Bp, HP), jnp.float32),                # c
            ],
        ),
        compiler_params=pltpu.CompilerParams(
            dimension_semantics=("arbitrary",),                   # recurrent axis
            vmem_limit_bytes=32 * 1024 * 1024,
        ),
    )(xs_p, hx_p, cx_p,
      packed["w1"], packed["b1"], packed["w2"], packed["b2"],
      packed["wl"], packed["bl"], packed["w3"], packed["b3"])

    return ys[:, :B, :nb_actions], (hxo[:B, :HID2], cxo[:B, :HID2])


def actor_forward(x, hx, cx, packed, nb_actions):
    """Single-step convenience wrapper matching the module's forward()."""
    ys, (hx_new, cx_new) = actor_forward_seq(x[None], hx, cx, packed, nb_actions)
    return ys[0], (hx_new, cx_new)


# ----------------------------------------------------------------------------
# Parameter init (mirrors the PyTorch init) and host-side packing/padding.
# ----------------------------------------------------------------------------
def init_params(key, nb_states, nb_actions, init_w=0.003):
    """Logical (unpadded) params; linear weights stored as (in, out)."""
    ks = jax.random.split(key, 10)

    def unif(k, shape, bound):
        return jax.random.uniform(k, shape, jnp.float32, -bound, bound)

    w1 = unif(ks[0], (nb_states, HID1), 1.0 / np.sqrt(HID1))   # fanin_init, fanin=20
    b1 = unif(ks[1], (HID1,), 1.0 / np.sqrt(nb_states))
    w2 = unif(ks[2], (HID1, HID2), 1.0 / np.sqrt(HID2))        # fanin_init, fanin=50
    b2 = unif(ks[3], (HID2,), 1.0 / np.sqrt(HID1))
    vl = 1.0 / np.sqrt(HID2)                                   # LSTMCell default
    wih = unif(ks[4], (HID2, 4 * HID2), vl)
    whh = unif(ks[5], (HID2, 4 * HID2), vl)
    bih = unif(ks[6], (4 * HID2,), vl)
    bhh = unif(ks[7], (4 * HID2,), vl)
    w3 = unif(ks[8], (HID2, nb_actions), init_w)
    b3 = unif(ks[9], (nb_actions,), 1.0 / np.sqrt(HID2))
    return dict(w1=w1, b1=b1, w2=w2, b2=b2,
                wih=wih, whh=whh, bih=bih, bhh=bhh, w3=w3, b3=b3)


def pack_params(p, nb_states, nb_actions):
    """Pad to lane-aligned widths and fuse the LSTM input/hidden weights."""
    Sp = _round_up(nb_states, LANE)
    Ap = _round_up(nb_actions, LANE)

    w1 = np.zeros((Sp, HP), np.float32)
    w1[:nb_states, :HID1] = np.asarray(p["w1"])
    b1 = np.zeros((1, HP), np.float32)
    b1[0, :HID1] = np.asarray(p["b1"])

    w2 = np.zeros((HP, HP), np.float32)
    w2[:HID1, :HID2] = np.asarray(p["w2"])
    b2 = np.zeros((1, HP), np.float32)
    b2[0, :HID2] = np.asarray(p["b2"])

    # Fused LSTM weight: rows [0,50) act on h2, rows [128,178) act on h_prev.
    # Gate g occupies columns [g*128, g*128+50); padded lanes are zero.
    wl = np.zeros((2 * HP, 4 * HP), np.float32)
    bl = np.zeros((1, 4 * HP), np.float32)
    wih, whh = np.asarray(p["wih"]), np.asarray(p["whh"])
    bih, bhh = np.asarray(p["bih"]), np.asarray(p["bhh"])
    for g in range(4):
        wl[0:HID2, g * HP:g * HP + HID2] = wih[:, g * HID2:(g + 1) * HID2]
        wl[HP:HP + HID2, g * HP:g * HP + HID2] = whh[:, g * HID2:(g + 1) * HID2]
        bl[0, g * HP:g * HP + HID2] = (bih[g * HID2:(g + 1) * HID2]
                                       + bhh[g * HID2:(g + 1) * HID2])

    w3 = np.zeros((HP, Ap), np.float32)
    w3[:HID2, :nb_actions] = np.asarray(p["w3"])
    b3 = np.zeros((1, Ap), np.float32)
    b3[0, :nb_actions] = np.asarray(p["b3"])

    return dict(w1=jnp.asarray(w1), b1=jnp.asarray(b1),
                w2=jnp.asarray(w2), b2=jnp.asarray(b2),
                wl=jnp.asarray(wl), bl=jnp.asarray(bl),
                w3=jnp.asarray(w3), b3=jnp.asarray(b3))


# ----------------------------------------------------------------------------
# Pure-JAX reference (unpadded, two separate LSTM matmuls — PyTorch semantics).
# ----------------------------------------------------------------------------
def actor_reference_step(x, hx, cx, p):
    h1 = jnp.maximum(x @ p["w1"] + p["b1"], 0.0)
    h2 = jnp.maximum(h1 @ p["w2"] + p["b2"], 0.0)
    gates = h2 @ p["wih"] + p["bih"] + hx @ p["whh"] + p["bhh"]
    H = HID2
    i_g = jax.nn.sigmoid(gates[:, 0 * H:1 * H])
    f_g = jax.nn.sigmoid(gates[:, 1 * H:2 * H])
    g_g = jnp.tanh(gates[:, 2 * H:3 * H])
    o_g = jax.nn.sigmoid(gates[:, 3 * H:4 * H])
    c_new = f_g * cx + i_g * g_g
    h_new = o_g * jnp.tanh(c_new)
    y = jnp.tanh(h_new @ p["w3"] + p["b3"])
    return y, h_new, c_new


def actor_reference_seq(xs, hx, cx, p):
    ys = []
    for t in range(xs.shape[0]):
        y, hx, cx = actor_reference_step(xs[t], hx, cx, p)
        ys.append(y)
    return jnp.stack(ys, 0), (hx, cx)


if __name__ == "__main__":
    nb_states, nb_actions = 16, 4
    batch, T = 2, 8

    key = jax.random.PRNGKey(0)
    k_params, k_x = jax.random.split(key)
    logical = init_params(k_params, nb_states, nb_actions)
    packed = pack_params(logical, nb_states, nb_actions)

    xs = jax.random.normal(k_x, (T, batch, nb_states), jnp.float32)
    hx = jnp.zeros((batch, HID2), jnp.float32)
    cx = jnp.zeros((batch, HID2), jnp.float32)

    ys, (hx_new, cx_new) = actor_forward_seq(xs, hx, cx, packed, nb_actions)
    jax.block_until_ready((ys, hx_new, cx_new))

    ref_ys, (ref_hx, ref_cx) = actor_reference_seq(xs, hx, cx, logical)
    np.testing.assert_allclose(np.asarray(ys), np.asarray(ref_ys), rtol=1e-4, atol=1e-4)
    np.testing.assert_allclose(np.asarray(hx_new), np.asarray(ref_hx), rtol=1e-4, atol=1e-4)
    np.testing.assert_allclose(np.asarray(cx_new), np.asarray(ref_cx), rtol=1e-4, atol=1e-4)

    # Single-step path (matches the original per-call module usage) also works.
    y1, _ = actor_forward(xs[0], hx, cx, packed, nb_actions)
    jax.block_until_ready(y1)
    np.testing.assert_allclose(np.asarray(y1), np.asarray(ref_ys[0]), rtol=1e-4, atol=1e-4)

    print("KERNEL_OK")
</pallas_src>

<mosaic_0001>
module attributes {stable_mosaic.version = 11 : i64} {
  func.func @actor_seq_kernel(%arg0: i32, %arg1: memref<1x8x128xf32, #tpu.memory_space<vmem>>, %arg2: memref<8x128xf32, #tpu.memory_space<vmem>>, %arg3: memref<8x128xf32, #tpu.memory_space<vmem>>, %arg4: memref<128x128xf32, #tpu.memory_space<vmem>>, %arg5: memref<1x128xf32, #tpu.memory_space<vmem>>, %arg6: memref<128x128xf32, #tpu.memory_space<vmem>>, %arg7: memref<1x128xf32, #tpu.memory_space<vmem>>, %arg8: memref<256x512xf32, #tpu.memory_space<vmem>>, %arg9: memref<1x512xf32, #tpu.memory_space<vmem>>, %arg10: memref<128x128xf32, #tpu.memory_space<vmem>>, %arg11: memref<1x128xf32, #tpu.memory_space<vmem>>, %arg12: memref<1x8x128xf32, #tpu.memory_space<vmem>>, %arg13: memref<8x128xf32, #tpu.memory_space<vmem>>, %arg14: memref<8x128xf32, #tpu.memory_space<vmem>>, %arg15: memref<8x256xf32, #tpu.memory_space<vmem>>, %arg16: memref<8x128xf32, #tpu.memory_space<vmem>>) attributes {dimension_semantics = [#tpu.dimension_semantics<arbitrary>], iteration_bounds = array<i64: 8>, scalar_prefetch = 0 : i64, scratch_operands = 2 : i64, tpu.core_type = #tpu.core_type<tc>, window_params = [{transform_indices = @transform_0, window_bounds = array<i64: 1, 8, 128>}, {pipeline_mode = #tpu.pipeline_mode<synchronous>, transform_indices = @transform_1, window_bounds = array<i64: 8, 128>}, {pipeline_mode = #tpu.pipeline_mode<synchronous>, transform_indices = @transform_2, window_bounds = array<i64: 8, 128>}, {pipeline_mode = #tpu.pipeline_mode<synchronous>, transform_indices = @transform_3, window_bounds = array<i64: 128, 128>}, {pipeline_mode = #tpu.pipeline_mode<synchronous>, transform_indices = @transform_4, window_bounds = array<i64: 1, 128>}, {pipeline_mode = #tpu.pipeline_mode<synchronous>, transform_indices = @transform_5, window_bounds = array<i64: 128, 128>}, {pipeline_mode = #tpu.pipeline_mode<synchronous>, transform_indices = @transform_6, window_bounds = array<i64: 1, 128>}, {pipeline_mode = #tpu.pipeline_mode<synchronous>, transform_indices = @transform_7, window_bounds = array<i64: 256, 512>}, {pipeline_mode = #tpu.pipeline_mode<synchronous>, transform_indices = @transform_8, window_bounds = array<i64: 1, 512>}, {pipeline_mode = #tpu.pipeline_mode<synchronous>, transform_indices = @transform_9, window_bounds = array<i64: 128, 128>}, {pipeline_mode = #tpu.pipeline_mode<synchronous>, transform_indices = @transform_10, window_bounds = array<i64: 1, 128>}, {transform_indices = @transform_11, window_bounds = array<i64: 1, 8, 128>}, {pipeline_mode = #tpu.pipeline_mode<synchronous>, transform_indices = @transform_12, window_bounds = array<i64: 8, 128>}, {pipeline_mode = #tpu.pipeline_mode<synchronous>, transform_indices = @transform_13, window_bounds = array<i64: 8, 128>}]} {
    %c0_i32 = arith.constant 0 : i32
    %0 = arith.cmpi eq, %arg0, %c0_i32 : i32
    %1 = arith.extui %0 : i1 to i32
    %c0_i32_0 = arith.constant 0 : i32
    %2 = arith.cmpi ne, %1, %c0_i32_0 : i32
    scf.if %2 {
      %c0_40 = arith.constant 0 : index
      %c0_41 = arith.constant 0 : index
      %66 = vector.load %arg2[%c0_40, %c0_41] : memref<8x128xf32, #tpu.memory_space<vmem>>, vector<8x128xf32>
      %c0_42 = arith.constant 0 : index
      %c128_43 = arith.constant 128 : index
      %67 = vector.load %arg15[%c0_42, %c128_43] : memref<8x256xf32, #tpu.memory_space<vmem>>, vector<8x128xf32>
      tpu.vector_store %arg15[%c0_42, %c128_43], %66 {strides = array<i32>} : memref<8x256xf32, #tpu.memory_space<vmem>>, vector<8x128xf32>,
      %c0_44 = arith.constant 0 : index
      %c0_45 = arith.constant 0 : index
      %68 = vector.load %arg3[%c0_44, %c0_45] : memref<8x128xf32, #tpu.memory_space<vmem>>, vector<8x128xf32>
      %c0_46 = arith.constant 0 : index
      %c0_47 = arith.constant 0 : index
      %69 = vector.load %arg16[%c0_46, %c0_47] : memref<8x128xf32, #tpu.memory_space<vmem>>, vector<8x128xf32>
      tpu.vector_store %arg16[%c0_46, %c0_47], %68 {strides = array<i32>} : memref<8x128xf32, #tpu.memory_space<vmem>>, vector<8x128xf32>,
    } else {
    }
    %c0 = arith.constant 0 : index
    %c0_1 = arith.constant 0 : index
    %c0_2 = arith.constant 0 : index
    %3 = vector.load %arg1[%c0, %c0_1, %c0_2] : memref<1x8x128xf32, #tpu.memory_space<vmem>>, vector<1x8x128xf32>
    %4 = vector.shape_cast %3 : vector<1x8x128xf32> to vector<8x128xf32>
    %c0_3 = arith.constant 0 : index
    %c0_4 = arith.constant 0 : index
    %5 = vector.load %arg4[%c0_3, %c0_4] : memref<128x128xf32, #tpu.memory_space<vmem>>, vector<128x128xf32>
    %cst = arith.constant dense<0.000000e+00> : vector<8x128xf32>
    %6 = tpu.matmul %4, %5, %cst {dimension_numbers = #tpu.dot_dimension_numbers<[1], [0], [0], [1], [0, 0, 1, 1], [], []>} : vector<8x128xf32>, vector<128x128xf32>, vector<8x128xf32> -> vector<8x128xf32>
    %c0_5 = arith.constant 0 : index
    %c0_6 = arith.constant 0 : index
    %7 = vector.load %arg5[%c0_5, %c0_6] : memref<1x128xf32, #tpu.memory_space<vmem>>, vector<1x128xf32>
    %8 = vector.broadcast %7 : vector<1x128xf32> to vector<8x128xf32>
    %9 = arith.addf %6, %8 : vector<8x128xf32>
    %cst_7 = arith.constant 0.000000e+00 : f32
    %10 = vector.broadcast %cst_7 : f32 to vector<8x128xf32>
    %11 = arith.maximumf %9, %10 : vector<8x128xf32>
    %c0_8 = arith.constant 0 : index
    %c0_9 = arith.constant 0 : index
    %12 = vector.load %arg6[%c0_8, %c0_9] : memref<128x128xf32, #tpu.memory_space<vmem>>, vector<128x128xf32>
    %cst_10 = arith.constant dense<0.000000e+00> : vector<8x128xf32>
    %13 = tpu.matmul %11, %12, %cst_10 {dimension_numbers = #tpu.dot_dimension_numbers<[1], [0], [0], [1], [0, 0, 1, 1], [], []>} : vector<8x128xf32>, vector<128x128xf32>, vector<8x128xf32> -> vector<8x128xf32>
    %c0_11 = arith.constant 0 : index
    %c0_12 = arith.constant 0 : index
    %14 = vector.load %arg7[%c0_11, %c0_12] : memref<1x128xf32, #tpu.memory_space<vmem>>, vector<1x128xf32>
    %15 = vector.broadcast %14 : vector<1x128xf32> to vector<8x128xf32>
    %16 = arith.addf %13, %15 : vector<8x128xf32>
    %cst_13 = arith.constant 0.000000e+00 : f32
    %17 = vector.broadcast %cst_13 : f32 to vector<8x128xf32>
    %18 = arith.maximumf %16, %17 : vector<8x128xf32>
    %c0_14 = arith.constant 0 : index
    %c0_15 = arith.constant 0 : index
    %19 = vector.load %arg15[%c0_14, %c0_15] : memref<8x256xf32, #tpu.memory_space<vmem>>, vector<8x128xf32>
    tpu.vector_store %arg15[%c0_14, %c0_15], %18 {strides = array<i32>} : memref<8x256xf32, #tpu.memory_space<vmem>>, vector<8x128xf32>,
    %c0_16 = arith.constant 0 : index
    %c0_17 = arith.constant 0 : index
    %20 = vector.load %arg15[%c0_16, %c0_17] : memref<8x256xf32, #tpu.memory_space<vmem>>, vector<8x256xf32>
    %c0_18 = arith.constant 0 : index
    %c0_19 = arith.constant 0 : index
    %21 = vector.load %arg8[%c0_18, %c0_19] : memref<256x512xf32, #tpu.memory_space<vmem>>, vector<256x512xf32>
    %cst_20 = arith.constant dense<0.000000e+00> : vector<8x512xf32>
    %22 = tpu.matmul %20, %21, %cst_20 {dimension_numbers = #tpu.dot_dimension_numbers<[1], [0], [0], [1], [0, 0, 1, 1], [], []>} : vector<8x256xf32>, vector<256x512xf32>, vector<8x512xf32> -> vector<8x512xf32>
    %c0_21 = arith.constant 0 : index
    %c0_22 = arith.constant 0 : index
    %23 = vector.load %arg9[%c0_21, %c0_22] : memref<1x512xf32, #tpu.memory_space<vmem>>, vector<1x512xf32>
    %24 = vector.broadcast %23 : vector<1x512xf32> to vector<8x512xf32>
    %25 = arith.addf %22, %24 : vector<8x512xf32>
    %26 = vector.extract_strided_slice %25 {offsets = [0, 0], sizes = [8, 128], strides = [1, 1]} : vector<8x512xf32> to vector<8x128xf32>
    %27 = arith.negf %26 : vector<8x128xf32>
    %28 = math.exp %27 : vector<8x128xf32>
    %cst_23 = arith.constant 1.000000e+00 : f32
    %29 = vector.broadcast %cst_23 : f32 to vector<8x128xf32>
    %30 = arith.addf %29, %28 : vector<8x128xf32>
    %31 = arith.divf %29, %30 : vector<8x128xf32>
    %32 = vector.extract_strided_slice %25 {offsets = [0, 128], sizes = [8, 128], strides = [1, 1]} : vector<8x512xf32> to vector<8x128xf32>
    %33 = arith.negf %32 : vector<8x128xf32>
    %34 = math.exp %33 : vector<8x128xf32>
    %cst_24 = arith.constant 1.000000e+00 : f32
    %35 = vector.broadcast %cst_24 : f32 to vector<8x128xf32>
    %36 = arith.addf %35, %34 : vector<8x128xf32>
    %37 = arith.divf %35, %36 : vector<8x128xf32>
    %38 = vector.extract_strided_slice %25 {offsets = [0, 256], sizes = [8, 128], strides = [1, 1]} : vector<8x512xf32> to vector<8x128xf32>
    %39 = math.tanh %38 : vector<8x128xf32>
    %40 = vector.extract_strided_slice %25 {offsets = [0, 384], sizes = [8, 128], strides = [1, 1]} : vector<8x512xf32> to vector<8x128xf32>
    %41 = arith.negf %40 : vector<8x128xf32>
    %42 = math.exp %41 : vector<8x128xf32>
    %cst_25 = arith.constant 1.000000e+00 : f32
    %43 = vector.broadcast %cst_25 : f32 to vector<8x128xf32>
    %44 = arith.addf %43, %42 : vector<8x128xf32>
    %45 = arith.divf %43, %44 : vector<8x128xf32>
    %c0_26 = arith.constant 0 : index
    %c0_27 = arith.constant 0 : index
    %46 = vector.load %arg16[%c0_26, %c0_27] : memref<8x128xf32, #tpu.memory_space<vmem>>, vector<8x128xf32>
    %47 = arith.mulf %37, %46 : vector<8x128xf32>
    %48 = arith.mulf %31, %39 : vector<8x128xf32>
    %49 = arith.addf %47, %48 : vector<8x128xf32>
    %50 = math.tanh %49 : vector<8x128xf32>
    %51 = arith.mulf %45, %50 : vector<8x128xf32>
    %c0_28 = arith.constant 0 : index
    %c0_29 = arith.constant 0 : index
    %52 = vector.load %arg16[%c0_28, %c0_29] : memref<8x128xf32, #tpu.memory_space<vmem>>, vector<8x128xf32>
    tpu.vector_store %arg16[%c0_28, %c0_29], %49 {strides = array<i32>} : memref<8x128xf32, #tpu.memory_space<vmem>>, vector<8x128xf32>,
    %c0_30 = arith.constant 0 : index
    %c128 = arith.constant 128 : index
    %53 = vector.load %arg15[%c0_30, %c128] : memref<8x256xf32, #tpu.memory_space<vmem>>, vector<8x128xf32>
    tpu.vector_store %arg15[%c0_30, %c128], %51 {strides = array<i32>} : memref<8x256xf32, #tpu.memory_space<vmem>>, vector<8x128xf32>,
    %c0_31 = arith.constant 0 : index
    %c0_32 = arith.constant 0 : index
    %54 = vector.load %arg10[%c0_31, %c0_32] : memref<128x128xf32, #tpu.memory_space<vmem>>, vector<128x128xf32>
    %cst_33 = arith.constant dense<0.000000e+00> : vector<8x128xf32>
    %55 = tpu.matmul %51, %54, %cst_33 {dimension_numbers = #tpu.dot_dimension_numbers<[1], [0], [0], [1], [0, 0, 1, 1], [], []>} : vector<8x128xf32>, vector<128x128xf32>, vector<8x128xf32> -> vector<8x128xf32>
    %c0_34 = arith.constant 0 : index
    %c0_35 = arith.constant 0 : index
    %56 = vector.load %arg11[%c0_34, %c0_35] : memref<1x128xf32, #tpu.memory_space<vmem>>, vector<1x128xf32>
    %57 = vector.broadcast %56 : vector<1x128xf32> to vector<8x128xf32>
    %58 = arith.addf %55, %57 : vector<8x128xf32>
    %59 = math.tanh %58 : vector<8x128xf32>
    %c0_36 = arith.constant 0 : index
    %c0_37 = arith.constant 0 : index
    %c0_38 = arith.constant 0 : index
    %60 = vector.load %arg12[%c0_36, %c0_37, %c0_38] : memref<1x8x128xf32, #tpu.memory_space<vmem>>, vector<1x8x128xf32>
    %61 = vector.shape_cast %60 : vector<1x8x128xf32> to vector<8x128xf32>
    %62 = vector.shape_cast %59 : vector<8x128xf32> to vector<1x8x128xf32>
    tpu.vector_store %arg12[%c0_36, %c0_37, %c0_38], %62 {strides = array<i32>} : memref<1x8x128xf32, #tpu.memory_space<vmem>>, vector<1x8x128xf32>,
    %c7_i32 = arith.constant 7 : i32
    %63 = arith.cmpi eq, %arg0, %c7_i32 : i32
    %64 = arith.extui %63 : i1 to i32
    %c0_i32_39 = arith.constant 0 : i32
    %65 = arith.cmpi ne, %64, %c0_i32_39 : i32
    scf.if %65 {
      %c0_40 = arith.constant 0 : index
      %c0_41 = arith.constant 0 : index
      %66 = vector.load %arg13[%c0_40, %c0_41] : memref<8x128xf32, #tpu.memory_space<vmem>>, vector<8x128xf32>
      tpu.vector_store %arg13[%c0_40, %c0_41], %51 {strides = array<i32>} : memref<8x128xf32, #tpu.memory_space<vmem>>, vector<8x128xf32>,
      %c0_42 = arith.constant 0 : index
      %c0_43 = arith.constant 0 : index
      %67 = vector.load %arg14[%c0_42, %c0_43] : memref<8x128xf32, #tpu.memory_space<vmem>>, vector<8x128xf32>
      tpu.vector_store %arg14[%c0_42, %c0_43], %49 {strides = array<i32>} : memref<8x128xf32, #tpu.memory_space<vmem>>, vector<8x128xf32>,
    } else {
    }
    return
  }
  func.func @transform_0(%arg0: i32) -> (i32, i32, i32) {
    %c0_i32 = arith.constant 0 : i32
    %c0_i32_0 = arith.constant 0 : i32
    %c0_i32_1 = arith.constant 0 : i32
    return %arg0, %c0_i32, %c0_i32_0 : i32, i32, i32
  }
  func.func @transform_1(%arg0: i32) -> (i32, i32) {
    %c0_i32 = arith.constant 0 : i32
    %c0_i32_0 = arith.constant 0 : i32
    %c0_i32_1 = arith.constant 0 : i32
    return %c0_i32, %c0_i32_0 : i32, i32
  }
  func.func @transform_2(%arg0: i32) -> (i32, i32) {
    %c0_i32 = arith.constant 0 : i32
    %c0_i32_0 = arith.constant 0 : i32
    %c0_i32_1 = arith.constant 0 : i32
    return %c0_i32, %c0_i32_0 : i32, i32
  }
  func.func @transform_3(%arg0: i32) -> (i32, i32) {
    %c0_i32 = arith.constant 0 : i32
    %c0_i32_0 = arith.constant 0 : i32
    %c0_i32_1 = arith.constant 0 : i32
    return %c0_i32, %c0_i32_0 : i32, i32
  }
  func.func @transform_4(%arg0: i32) -> (i32, i32) {
    %c0_i32 = arith.constant 0 : i32
    %c0_i32_0 = arith.constant 0 : i32
    %c0_i32_1 = arith.constant 0 : i32
    return %c0_i32, %c0_i32_0 : i32, i32
  }
  func.func @transform_5(%arg0: i32) -> (i32, i32) {
    %c0_i32 = arith.constant 0 : i32
    %c0_i32_0 = arith.constant 0 : i32
    %c0_i32_1 = arith.constant 0 : i32
    return %c0_i32, %c0_i32_0 : i32, i32
  }
  func.func @transform_6(%arg0: i32) -> (i32, i32) {
    %c0_i32 = arith.constant 0 : i32
    %c0_i32_0 = arith.constant 0 : i32
    %c0_i32_1 = arith.constant 0 : i32
    return %c0_i32, %c0_i32_0 : i32, i32
  }
  func.func @transform_7(%arg0: i32) -> (i32, i32) {
    %c0_i32 = arith.constant 0 : i32
    %c0_i32_0 = arith.constant 0 : i32
    %c0_i32_1 = arith.constant 0 : i32
    return %c0_i32, %c0_i32_0 : i32, i32
  }
  func.func @transform_8(%arg0: i32) -> (i32, i32) {
    %c0_i32 = arith.constant 0 : i32
    %c0_i32_0 = arith.constant 0 : i32
    %c0_i32_1 = arith.constant 0 : i32
    return %c0_i32, %c0_i32_0 : i32, i32
  }
  func.func @transform_9(%arg0: i32) -> (i32, i32) {
    %c0_i32 = arith.constant 0 : i32
    %c0_i32_0 = arith.constant 0 : i32
    %c0_i32_1 = arith.constant 0 : i32
    return %c0_i32, %c0_i32_0 : i32, i32
  }
  func.func @transform_10(%arg0: i32) -> (i32, i32) {
    %c0_i32 = arith.constant 0 : i32
    %c0_i32_0 = arith.constant 0 : i32
    %c0_i32_1 = arith.constant 0 : i32
    return %c0_i32, %c0_i32_0 : i32, i32
  }
  func.func @transform_11(%arg0: i32) -> (i32, i32, i32) {
    %c0_i32 = arith.constant 0 : i32
    %c0_i32_0 = arith.constant 0 : i32
    %c0_i32_1 = arith.constant 0 : i32
    return %arg0, %c0_i32, %c0_i32_0 : i32, i32, i32
  }
  func.func @transform_12(%arg0: i32) -> (i32, i32) {
    %c0_i32 = arith.constant 0 : i32
    %c0_i32_0 = arith.constant 0 : i32
    %c0_i32_1 = arith.constant 0 : i32
    return %c0_i32, %c0_i32_0 : i32, i32
  }
  func.func @transform_13(%arg0: i32) -> (i32, i32) {
    %c0_i32 = arith.constant 0 : i32
    %c0_i32_0 = arith.constant 0 : i32
    %c0_i32_1 = arith.constant 0 : i32
    return %c0_i32, %c0_i32_0 : i32, i32
  }
}

</mosaic_0001>

<bundles_post_ra>
// kernel: tpu_custom_call.1
= control target key start
LH: loop header
LB: loop body
LE: loop exit
PB: predicated region body
PF: predicated region fallthrough
CT: control target
= control target key end

     0   :  { %s2089_s0 = inlined_call_operand.hbm [shape: f32[8,8,128], index: 0, kind: input, shape index: {}]   ;;  %s2090_s1 = inlined_call_operand.hbm [shape: f32[8,128], index: 1, kind: input, shape index: {}]   ;;  %s2091_s2 = inlined_call_operand.hbm [shape: f32[8,128], index: 2, kind: input, shape index: {}]   ;;  %s2092_s3 = inlined_call_operand.hbm [shape: f32[128,128], index: 3, kind: input, shape index: {}]   ;;  %s2093_s4 = inlined_call_operand.vmem [shape: f32[1,128], index: 4, kind: input, shape index: {}]   ;;  %s2094_s5 = inlined_call_operand.hbm [shape: f32[128,128], index: 5, kind: input, shape index: {}]   ;;  %s2095_s6 = inlined_call_operand.vmem [shape: f32[1,128], index: 6, kind: input, shape index: {}]   ;;  %s2096_s7 = inlined_call_operand.hbm [shape: f32[256,512], index: 7, kind: input, shape index: {}]   ;;  %s2097_s8 = inlined_call_operand.vmem [shape: f32[1,512], index: 8, kind: input, shape index: {}]   ;;  %s2098_s9 = inlined_call_operand.hbm [shape: f32[128,128], index: 9, kind: input, shape index: {}]   ;;  %s2099_s10 = inlined_call_operand.vmem [shape: f32[1,128], index: 10, kind: input, shape index: {}]   ;;  %s2100_s11 = inlined_call_operand.hbm [shape: f32[8,8,128], index: 11, kind: output, shape index: {0}]   ;;  %s2101_s12 = inlined_call_operand.hbm [shape: f32[8,128], index: 12, kind: output, shape index: {1}]   ;;  %s2102_s13 = inlined_call_operand.hbm [shape: f32[8,128], index: 13, kind: output, shape index: {2}]  }
   0x1   :  { %2105 = sst [smem:[#allocation26_spill]] %s2089_s0 }
   0x2   :  { %2106 = sst [smem:[#allocation27_spill]] %s2090_s1 }
   0x3   :  { %2107 = sst [smem:[#allocation28_spill]] %s2091_s2 }
   0x4   :  { %2108 = sst [smem:[#allocation29_spill]] %s2092_s3 }
   0x5   :  { %2109 = sst [smem:[#allocation30_spill]] %s2094_s5 }
   0x6   :  { %2110 = sst [smem:[#allocation31_spill]] %s2096_s7 }
   0x7   :  { %2111 = sst [smem:[#allocation32_spill]] %s2098_s9 }
   0x8   :  { %2112 = sst [smem:[#allocation33_spill]] %s2100_s11 }
   0x9   :  { %2113 = sst [smem:[#allocation34_spill]] %s2102_s13 }
   0xa   :  { %19 = vsyncpa [#allocation5], 0 }
   0xb   :  { %21 = vsyncpa [#allocation5 + $0x1], 0 }
   0xc   :  { %22 = vsyncpa [#allocation8], 0 }
   0xd   :  { %23 = vsyncpa [#allocation11], 0 }
   0xe   :  { %24 = vsyncpa [#allocation14], 0 }
   0xf   :  { %25 = vsyncpa [#allocation6], 0 }
  0x10   :  { %27 = vsyncpa [#allocation6 + $0x1], 0 }
  0x11   :  { %28 = vsyncpa [#allocation18], 0  ;;  %s1856_s25 = smov 0   ;;  %s1858_s26 = smov 0  }
  0x12   :  { %s1860_s27 = smov 0   ;;  %s1862_s28 = smov 0  }
  0x13 LB: > { %s2114_s1 = sld [smem:[#allocation27_spill]]  ;;  %s1880_s15 = sadd.s32 4294967295, %s1772_s28   ;;  %s1772_s28 = sphi %s1862_s28, %s2138_s28   ;;  %s1768_s27 = sphi %s1860_s27, %s2137_s27   ;;  %s1764_s26 = sphi %s1858_s26, %s2136_s26   ;;  %s1760_s25 = sphi %s1856_s25, %s2135_s25  }
  0x14   : > { %p1246_p0 = scmp.ge.s32.totalorder %s1772_s28, 1  ;;  %p55_p1 = scmp.eq.s32.totalorder %s1880_s15, 0 }
  0x15   : > { %p343_p2 = scmp.lt.s32.totalorder %s1772_s28, 9  ;;  %s1774_s17 = smov [#allocation7]  }
  0x16   : > { %s357_s18 = sshll.u32 %s1774_s17, 4  ;;  %s2116_s3 = sld [smem:[#allocation29_spill]]  ;;  %s358_s18 = int_to_ptr.vmem [resolvable:$true] %s357_s18 }
  0x17   : > { %p1886_p4 = pnand %p1246_p0, %p343_p2  ;;  %s1775_s23 = smov [#allocation10]  }
  0x18   : > { %s380_s24 = sshll.u32 %s1775_s23, 4  ;;  %s1776_s29 = smov 128   ;;  %s381_s24 = int_to_ptr.vmem [resolvable:$true] %s380_s24 }
  0x19   : > { %s355_s14 = sshll.u32 %s2114_s1, 4  ;;  %p1314_p5 = pneg %p1886_p4  ;;  %s356_s14 = int_to_ptr.hbm [resolvable:$true] %s355_s14 }
  0x1a   : > { %s1777_s30 = smov 8   ;;  %s2118_s7 = sld [smem:[#allocation31_spill]] }
  0x1b   : > { %p1897_p6 = pnand %p1314_p5, %p55_p1  ;;  %s1778_s1 = smov [#allocation13]  }
  0x1c   : > { %s378_s21 = sshll.u32 %s2116_s3, 4  ;;  %s414_s3 = sshll.u32 %s1778_s1, 4  ;;  %s379_s21 = int_to_ptr.hbm [resolvable:$true] %s378_s21  ;;  %s415_s3 = int_to_ptr.vmem [resolvable:$true] %s414_s3 }
  0x1d   : > { %1317 = dma.hbm_to_vmem [thread:$0]  (!%p1897_p6), %s356_s14, 128, %s358_s18, [#allocation8]  }
  0x1e   : > { %1323 = dma.hbm_to_vmem [thread:$0]  (!%p1897_p6), %s379_s21, 2048, %s381_s24, [#allocation11], %s1776_s29, %s1776_s29, %s1777_s30  }
  0x1f   : > { %s2119_s2 = sld [smem:[#allocation28_spill]]  ;;  %s1779_s18 = smov 512  }
  0x20   : > { %s412_s20 = sshll.u32 %s2118_s7, 4  ;;  %s1780_s11 = smov 32   ;;  %s413_s20 = int_to_ptr.hbm [resolvable:$true] %s412_s20 }
  0x21   : > { %1329 = dma.hbm_to_vmem [thread:$0]  (!%p1897_p6), %s413_s20, 16384, %s415_s3, [#allocation14], %s1779_s18, %s1779_s18, %s1780_s11  }
  0x22   : > { %s1781_s21 = smov [#allocation9]   ;;  %s2120_s5 = sld [smem:[#allocation30_spill]] }
  0x23   : > { %s369_s24 = sshll.u32 %s1781_s21, 4  ;;  %s2121_s9 = sld [smem:[#allocation32_spill]]  ;;  %s370_s24 = int_to_ptr.vmem [resolvable:$true] %s369_s24 }
  0x24   : > { %s1782_s11 = smov [#allocation12]   ;;  %s1245_s21 = sadd.s32 4294967294, %s1772_s28  }
  0x25   : > { %s367_s14 = sshll.u32 %s2119_s2, 4  ;;  %s397_s20 = sshll.u32 %s1782_s11, 4  ;;  %s368_s14 = int_to_ptr.hbm [resolvable:$true] %s367_s14  ;;  %s398_s20 = int_to_ptr.vmem [resolvable:$true] %s397_s20 }
  0x26   : > { %1320 = dma.hbm_to_vmem [thread:$0]  (!%p1897_p6), %s368_s14, 128, %s370_s24, [#allocation8]  }
  0x27   : > { %s1783_s14 = smov [#allocation15]   ;;  %s1936_s24 = sadd.s32 1, %s1772_s28  }
  0x28   : > { %s395_s1 = sshll.u32 %s2120_s5, 4  ;;  %s431_s18 = sshll.u32 %s1783_s14, 4  ;;  %s396_s1 = int_to_ptr.hbm [resolvable:$true] %s395_s1  ;;  %s432_s18 = int_to_ptr.vmem [resolvable:$true] %s431_s18 }
  0x29   : > { %s429_s3 = sshll.u32 %s2121_s9, 4  ;;  %s38_s17 = ssub.s32 %s1772_s28, %s1936_s24  ;;  %s430_s3 = int_to_ptr.hbm [resolvable:$true] %s429_s3 }
  0x2a   : > { %1326 = dma.hbm_to_vmem [thread:$0]  (!%p1897_p6), %s396_s1, 2048, %s398_s20, [#allocation11], %s1776_s29, %s1776_s29, %s1777_s30  }
  0x2b   : > { %1332 = dma.hbm_to_vmem [thread:$0]  (!%p1897_p6), %s430_s3, 2048, %s432_s18, [#allocation14], %s1776_s29, %s1776_s29, %s1777_s30  }
  0x2c   : > { %s41_s19 = sadd.s32 1, %s1768_s27  ;;  %p39_p7 = scmp.eq.s32.totalorder %s38_s17, 0 }
  0x2d   : > { %p48_p8 = scmp.ne.s32.totalorder %s1768_s27, %s1764_s26  ;;  %p49_p9 = scmp.eq.s32.totalorder %s1772_s28, 0 }
  0x2e   : > { %p54_p10 = scmp.ne.s32.totalorder %s1764_s26, %s1760_s25  ;;  %p2104_p13 = scmp.eq.s32.totalorder %s1880_s15, 7 }
  0x2f   : > { %s1947_s1 = scalar_select %p39_p7, %s1768_s27, %s41_s19  }
  0x30   : > { %p1949_p11 = por %p49_p9, %p48_p8  ;;  %p1955_p12 = por %p55_p1, %p54_p10 }
  0x31   : > { %p294_p0 = scmp.eq.s32.totalorder %s1245_s21, 7  ;;  %p1347_p2 = scmp.lt.s32.totalorder %s1772_s28, 8 }
  0x32   : > { %s448_s30 = sand.u32 1, %s1768_s27   ;;  %p1964_p5 = por %p2104_p13, %p48_p8 }
  0x33   : > { %p1968_p6 = por %p294_p0, %p54_p10  ;;  %s1254_s3 = sshll.u32 %s448_s30, 3 }
  0x34   : > { %s1255_s11 = sshll.u32 %s1772_s28, 3  ;;  %s2126_s0 = sld [smem:[#allocation26_spill]] }
  0x35   : > { %s452_s17 = scalar_lea.vmem [#allocation4], %s1254_s3  ;;  %p1978_p7 = pnand %p1347_p2, %p1949_p11 }
  0x36   : > { %s460_s19 = sshll.u32 %s452_s17, 4  ;;  %s449_s5 = scalar_lea.sflag [#allocation5], %s448_s30  ;;  %s461_s19 = int_to_ptr.vmem [resolvable:$true] %s460_s19 }
  0x37   : > { %p1608_p9 = pneg %p1978_p7 }
  0x3a   : > { %s456_s18 = scalar_lea.hbm %s2126_s0, %s1255_s11  ;;  %s1611_s20 = scalar_lea.hbm %s2126_s0, 64 }
  0x3b   : > { %s458_s21 = sshll.u32 %s456_s18, 4  ;;  %s459_s21 = int_to_ptr.hbm [resolvable:$true] %s458_s21 }
  0x3c   : > { %s1604_s7 = sshra.s32 %s459_s21, 4  ;;  %s1605_s7 = int_to_ptr.hbm [resolvable:$true] %s1604_s7 }
  0x3d   : > { %s1606_s9 = scalar_lea.hbm %s1605_s7, 8  ;;  %p1612_p11 = scmp.lt.s32.totalorder %s1605_s7, %s2126_s0 }
  0x3e   : > { %p1607_p8 = scmp.ne.s32.totalorder %s1605_s7, %s1606_s9  ;;  %p1613_p2 = scmp.lt.s32.totalorder %s1611_s20, %s1606_s9 }
  0x40   : > { %p1609_p10 = pnand %p1608_p9, %p1607_p8  ;;  %p1614_p13 = por %p1613_p2, %p1612_p11 }
  0x42   : > { %p1610_p0 = pneg %p1609_p10 }
  0x44   : > { %p1615_p3 = pnand %p1614_p13, %p1610_p0 }
  0x46   : > { %1618 = shalt.err (!%p1615_p3)
}
  0x47   : > { %1336 = dma.hbm_to_vmem [thread:$0]  (!%p1978_p7), %s459_s21, 128, %s461_s19, %s449_s5  }
  0x48   : > { %469 = sbr.rel (%p1886_p4) target bundleno = 742 (0x2e6), region = 64  ;;  %s1995_s30 = sand.u32 (!%p1886_p4), 1, %s1764_s26  }
  0x49   : > { %s1257_s18 = sshll.u32 (!%p1886_p4), %s1995_s30, 3  ;;  %s472_s17 = scalar_lea.sflag (!%p1886_p4), [#allocation5], %s1995_s30 }
  0x4a   : > { %s1999_s3 = scalar_lea.vmem (!%p1886_p4), [#allocation4], %s1257_s18 }
  0x4d   : > { %1735 = dma.done.wait (%p1955_p12), %s472_s17, 128  }
  0x4e   : > { %1737 = vsyncadd (%p1955_p12), %s472_s17, 4294967168 }
  0x4f   : > { %1739 = dma.done.wait (%p55_p1), [#allocation8], 256  }
  0x50   : > { %1741 = vsyncadd (%p55_p1), [#allocation8], 4294967040 }
  0x51   : > { %1743 = dma.done.wait (%p55_p1), [#allocation11], 4096  }
  0x52   : > { %1745 = vsyncadd (%p55_p1), [#allocation11], 4294963200 }
  0x53   : > { %1747 = dma.done.wait (%p55_p1), [#allocation14], 18432  }
  0x54   : > { %1749 = vsyncadd (%p55_p1), [#allocation14], 4294948864  ;;  %s2017_s2 = scalar_lea.vmem [#allocation16], %s1257_s18  ;;  %p2128_p3 = scmp.ne.s32.totalorder %s1880_s15, 0 }
  0x56   : > { %552 = sbr.rel (%p2128_p3) target bundleno = 94 (0x5e), region = 96 }
  0x5b   : > { %v553_v0 = vld [vmem:[#allocation7] sm:$0xff]  ;;  %v555_v1 = vld [vmem:[#allocation9] sm:$0xff] }
  0x5c   : > { %554 = vst [vmem:[#allocation2 + $0x8] sm:$0xff] %v553_v0 }
  0x5d   : > { %556 = vst [vmem:[#allocation3] sm:$0xff] %v555_v1 }
  0x5e PF: > { %v573_v2 = vld [vmem:[#allocation10 + $0x78] sm:$0xff]  ;;  %v572_v3 = vld [vmem:[#allocation10 + $0x70] sm:$0xff]  ;;  %v571_v4 = vld [vmem:[#allocation10 + $0x68] sm:$0xff]  ;;  %p1269_p1 = scmp.ne.s32.totalorder %s1880_s15, 7 }
  0x5f   : > { %578 = vmatpush.msra.mxu0 %v573_v2  ;;  %v570_v5 = vld [vmem:[#allocation10 + $0x60] sm:$0xff]  ;;  %v614_v6 = vld [vmem:[#allocation12 + $0x78] sm:$0xff]  ;;  %v613_v8 = vld [vmem:[#allocation12 + $0x70] sm:$0xff] }
  0x60   : > { %v569_v7 = vld [vmem:[#allocation10 + $0x58] sm:$0xff]  ;;  %619 = vmatpush.msra.mxu1 %v614_v6  ;;  %v612_v9 = vld [vmem:[#allocation12 + $0x68] sm:$0xff]  ;;  %v568_v10 = vld [vmem:[#allocation10 + $0x50] sm:$0xff] }
  0x61   : > { %579 = vmatpush.msra.mxu0 %v572_v3  ;;  %v611_v11 = vld [vmem:[#allocation12 + $0x60] sm:$0xff]  ;;  %v567_v12 = vld [vmem:[#allocation10 + $0x48] sm:$0xff]  ;;  %v610_v13 = vld [vmem:[#allocation12 + $0x58] sm:$0xff] }
  0x62   : > { %620 = vmatpush.msra.mxu1 %v613_v8  ;;  %v566_v14 = vld [vmem:[#allocation10 + $0x40] sm:$0xff]  ;;  %v609_v15 = vld [vmem:[#allocation12 + $0x50] sm:$0xff]  ;;  %v565_v16 = vld [vmem:[#allocation10 + $0x38] sm:$0xff] }
  0x63   : > { %580 = vmatpush.msra.mxu0 %v571_v4  ;;  %v608_v17 = vld [vmem:[#allocation12 + $0x48] sm:$0xff]  ;;  %v564_v18 = vld [vmem:[#allocation10 + $0x30] sm:$0xff]  ;;  %v607_v19 = vld [vmem:[#allocation12 + $0x40] sm:$0xff] }
  0x64   : > { %621 = vmatpush.msra.mxu1 %v612_v9  ;;  %v563_v20 = vld [vmem:[#allocation10 + $0x28] sm:$0xff]  ;;  %v606_v21 = vld [vmem:[#allocation12 + $0x38] sm:$0xff]  ;;  %v562_v22 = vld [vmem:[#allocation10 + $0x20] sm:$0xff] }
  0x65   : > { %581 = vmatpush.msra.mxu0 %v570_v5  ;;  %v605_v23 = vld [vmem:[#allocation12 + $0x30] sm:$0xff]  ;;  %v561_v24 = vld [vmem:[#allocation10 + $0x18] sm:$0xff]  ;;  %v604_v25 = vld [vmem:[#allocation12 + $0x28] sm:$0xff] }
  0x66   : > { %622 = vmatpush.msra.mxu1 %v611_v11  ;;  %v560_v26 = vld [vmem:[#allocation10 + $0x10] sm:$0xff]  ;;  %v603_v27 = vld [vmem:[#allocation12 + $0x20] sm:$0xff]  ;;  %v559_v28 = vld [vmem:[#allocation10 + $0x8] sm:$0xff] }
  0x67   : > { %582 = vmatpush.msra.mxu0 %v569_v7  ;;  %v602_v29 = vld [vmem:[#allocation12 + $0x18] sm:$0xff]  ;;  %v558_v30 = vld [vmem:[#allocation10] sm:$0xff]  ;;  %v601_v32 = vld [vmem:[#allocation12 + $0x10] sm:$0xff] }
  0x68   : > { %623 = vmatpush.msra.mxu1 %v610_v13  ;;  %v557_v31 = vld [vmem:[%s1999_s3] sm:$0xff] }
  0x69   : > { %583 = vmatpush.msra.mxu0 %v568_v10  ;;  %v600_v33 = vld [vmem:[#allocation12 + $0x8] sm:$0xff]  ;;  %v599_v34 = vld [vmem:[#allocation12] sm:$0xff] }
  0x6a   : > { %624 = vmatpush.msra.mxu1 %v609_v15  ;;  %v703_v35 = vld [vmem:[#allocation13 + $0x1e0] sm:$0xff]  ;;  %v704_v36 = vld [vmem:[#allocation13 + $0x1e8] sm:$0xff] }
  0x6b   : > { %584 = vmatpush.msra.mxu0 %v567_v12  ;;  %v699_v37 = vld [vmem:[#allocation13 + $0x1c0] sm:$0xff]  ;;  %781 = vmatpush.msra.mxu2 %v703_v35  ;;  %v700_v39 = vld [vmem:[#allocation13 + $0x1c8] sm:$0xff] }
  0x6c   : > { %625 = vmatpush.msra.mxu1 %v608_v17  ;;  %v767_v38 = vld [vmem:[#allocation13 + $0x3e0] sm:$0xff]  ;;  %v768_v40 = vld [vmem:[#allocation13 + $0x3e8] sm:$0xff] }
  0x6d   : > { %585 = vmatpush.msra.mxu0 %v566_v14  ;;  %801 = vmatpush.msra.mxu3 %v767_v38  ;;  %v695_v41 = vld [vmem:[#allocation13 + $0x1a0] sm:$0xff]  ;;  %v696_v43 = vld [vmem:[#allocation13 + $0x1a8] sm:$0xff]  ;;  %v706_v38 = vld [vmem:[#allocation13 + $0x1f8] sm:$0xff] }
  0x6e   : > { %626 = vmatpush.msra.mxu1 %v607_v19  ;;  %v763_v42 = vld [vmem:[#allocation13 + $0x3c0] sm:$0xff]  ;;  %782 = vmatpush.msra.mxu2 %v699_v37  ;;  %v764_v44 = vld [vmem:[#allocation13 + $0x3c8] sm:$0xff] }
  0x6f   : > { %586 = vmatpush.msra.mxu0 %v565_v16  ;;  %v759_v45 = vld [vmem:[#allocation13 + $0x3a0] sm:$0xff]  ;;  %802 = vmatpush.msra.mxu3 %v763_v42  ;;  %v692_v47 = vld [vmem:[#allocation13 + $0x188] sm:$0xff]  ;;  %v769_v42 = vld [vmem:[#allocation13 + $0x3f0] sm:$0xff] }
  0x70   : > { %627 = vmatpush.msra.mxu1 %v606_v21  ;;  %v691_v46 = vld [vmem:[#allocation13 + $0x180] sm:$0xff]  ;;  %v760_v48 = vld [vmem:[#allocation13 + $0x3a8] sm:$0xff]  ;;  %783 = vmatpush.msra.mxu2 %v695_v41  ;;  %v701_v41 = vld [vmem:[#allocation13 + $0x1d0] sm:$0xff] }
  0x71   : > { %587 = vmatpush.msra.mxu0 %v564_v18  ;;  %v755_v49 = vld [vmem:[#allocation13 + $0x380] sm:$0xff]  ;;  %v756_v50 = vld [vmem:[#allocation13 + $0x388] sm:$0xff]  ;;  %803 = vmatpush.msra.mxu3 %v759_v45  ;;  %v697_v45 = vld [vmem:[#allocation13 + $0x1b0] sm:$0xff] }
  0x72   : > { %628 = vmatpush.msra.mxu1 %v605_v23  ;;  %v687_v51 = vld [vmem:[#allocation13 + $0x160] sm:$0xff]  ;;  %v688_v52 = vld [vmem:[#allocation13 + $0x168] sm:$0xff]  ;;  %784 = vmatpush.msra.mxu2 %v691_v46  ;;  %v765_v46 = vld [vmem:[#allocation13 + $0x3d0] sm:$0xff] }
  0x73   : > { %588 = vmatpush.msra.mxu0 %v563_v20  ;;  %v751_v53 = vld [vmem:[#allocation13 + $0x360] sm:$0xff]  ;;  %v752_v54 = vld [vmem:[#allocation13 + $0x368] sm:$0xff]  ;;  %804 = vmatpush.msra.mxu3 %v755_v49  ;;  %v693_v49 = vld [vmem:[#allocation13 + $0x190] sm:$0xff] }
  0x74   : > { %629 = vmatpush.msra.mxu1 %v604_v25  ;;  %v683_v55 = vld [vmem:[#allocation13 + $0x140] sm:$0xff]  ;;  %v684_v56 = vld [vmem:[#allocation13 + $0x148] sm:$0xff]  ;;  %785 = vmatpush.msra.mxu2 %v687_v51  ;;  %v694_v51 = vld [vmem:[#allocation13 + $0x198] sm:$0xff] }
  0x75   : > { %589 = vmatpush.msra.mxu0 %v562_v22  ;;  %v747_v57 = vld [vmem:[#allocation13 + $0x340] sm:$0xff]  ;;  %v748_v58 = vld [vmem:[#allocation13 + $0x348] sm:$0xff]  ;;  %805 = vmatpush.msra.mxu3 %v751_v53  ;;  %v689_v53 = vld [vmem:[#allocation13 + $0x170] sm:$0xff] }
  0x76   : > { %630 = vmatpush.msra.mxu1 %v603_v27  ;;  %v679_v59 = vld [vmem:[#allocation13 + $0x120] sm:$0xff]  ;;  %v680_v60 = vld [vmem:[#allocation13 + $0x128] sm:$0xff]  ;;  %786 = vmatpush.msra.mxu2 %v683_v55  ;;  %v690_v55 = vld [vmem:[#allocation13 + $0x178] sm:$0xff] }
  0x77   : > { %590 = vmatpush.msra.mxu0 %v561_v24  ;;  %v743_v61 = vld [vmem:[#allocation13 + $0x320] sm:$0xff]  ;;  %v744_v62 = vld [vmem:[#allocation13 + $0x328] sm:$0xff]  ;;  %806 = vmatpush.msra.mxu3 %v747_v57  ;;  %v685_v57 = vld [vmem:[#allocation13 + $0x150] sm:$0xff] }
  0x78   : > { %631 = vmatpush.msra.mxu1 %v602_v29  ;;  %v675_v63 = vld [vmem:[#allocation13 + $0x100] sm:$0xff]  ;;  %v676_v0 = vld [vmem:[#allocation13 + $0x108] sm:$0xff]  ;;  %787 = vmatpush.msra.mxu2 %v679_v59  ;;  %v686_v59 = vld [vmem:[#allocation13 + $0x158] sm:$0xff] }
  0x79   : > { %591 = vmatpush.msra.mxu0 %v560_v26  ;;  %v739_v1 = vld [vmem:[#allocation13 + $0x300] sm:$0xff]  ;;  %v740_v2 = vld [vmem:[#allocation13 + $0x308] sm:$0xff]  ;;  %807 = vmatpush.msra.mxu3 %v743_v61  ;;  %v681_v61 = vld [vmem:[#allocation13 + $0x130] sm:$0xff] }
  0x7a   : > { %632 = vmatpush.msra.mxu1 %v601_v32  ;;  %v671_v3 = vld [vmem:[#allocation13 + $0xe0] sm:$0xff]  ;;  %v672_v4 = vld [vmem:[#allocation13 + $0xe8] sm:$0xff]  ;;  %788 = vmatpush.msra.mxu2 %v675_v63  ;;  %v682_v63 = vld [vmem:[#allocation13 + $0x138] sm:$0xff] }
  0x7b   : > { %592 = vmatpush.msra.mxu0 %v559_v28  ;;  %v735_v5 = vld [vmem:[#allocation13 + $0x2e0] sm:$0xff]  ;;  %v736_v6 = vld [vmem:[#allocation13 + $0x2e8] sm:$0xff]  ;;  %808 = vmatpush.msra.mxu3 %v739_v1  ;;  %v677_v1 = vld [vmem:[#allocation13 + $0x110] sm:$0xff] }
  0x7c   : > { %633 = vmatpush.msra.mxu1 %v600_v33  ;;  %v667_v7 = vld [vmem:[#allocation13 + $0xc0] sm:$0xff]  ;;  %v668_v8 = vld [vmem:[#allocation13 + $0xc8] sm:$0xff]  ;;  %789 = vmatpush.msra.mxu2 %v671_v3  ;;  %v678_v3 = vld [vmem:[#allocation13 + $0x118] sm:$0xff] }
  0x7d   : > { %593 = vmatpush.msra.mxu0 %v558_v30  ;;  %v731_v9 = vld [vmem:[#allocation13 + $0x2c0] sm:$0xff]  ;;  %v732_v10 = vld [vmem:[#allocation13 + $0x2c8] sm:$0xff]  ;;  %809 = vmatpush.msra.mxu3 %v735_v5  ;;  %v673_v5 = vld [vmem:[#allocation13 + $0xf0] sm:$0xff] }
  0x7e   : > { %594 = vmatmul.f32.vlgmr.msra.gmra.mxu0 %v557_v31  ;;  %634 = vmatpush.msra.mxu1 %v599_v34  ;;  %v663_v11 = vld [vmem:[#allocation13 + $0xa0] sm:$0xff]  ;;  %v664_v12 = vld [vmem:[#allocation13 + $0xa8] sm:$0xff] }
  0x7f   : > { %821 = vmatpush.msrb.mxu0 %v704_v36  ;;  %790 = vmatpush.msra.mxu2 %v667_v7  ;;  %v727_v13 = vld [vmem:[#allocation13 + $0x2a0] sm:$0xff]  ;;  %v728_v14 = vld [vmem:[#allocation13 + $0x2a8] sm:$0xff]  ;;  %v705_v36 = vld [vmem:[#allocation13 + $0x1f0] sm:$0xff] }
  0x80   : > { %841 = vmatpush.msrb.mxu1 %v768_v40  ;;  %810 = vmatpush.msra.mxu3 %v731_v9  ;;  %v659_v15 = vld [vmem:[#allocation13 + $0x80] sm:$0xff]  ;;  %v660_v16 = vld [vmem:[#allocation13 + $0x88] sm:$0xff]  ;;  %v674_v7 = vld [vmem:[#allocation13 + $0xf8] sm:$0xff] }
  0x81   : > { %822 = vmatpush.msrb.mxu0 %v700_v39  ;;  %791 = vmatpush.msra.mxu2 %v663_v11  ;;  %v723_v17 = vld [vmem:[#allocation13 + $0x280] sm:$0xff]  ;;  %v724_v18 = vld [vmem:[#allocation13 + $0x288] sm:$0xff]  ;;  %v669_v9 = vld [vmem:[#allocation13 + $0xd0] sm:$0xff] }
  0x82   : > { %842 = vmatpush.msrb.mxu1 %v764_v44  ;;  %811 = vmatpush.msra.mxu3 %v727_v13  ;;  %v655_v19 = vld [vmem:[#allocation13 + $0x60] sm:$0xff]  ;;  %v656_v20 = vld [vmem:[#allocation13 + $0x68] sm:$0xff]  ;;  %v770_v44 = vld [vmem:[#allocation13 + $0x3f8] sm:$0xff] }
  0x83   : > { %823 = vmatpush.msrb.mxu0 %v696_v43  ;;  %792 = vmatpush.msra.mxu2 %v659_v15  ;;  %v719_v21 = vld [vmem:[#allocation13 + $0x260] sm:$0xff]  ;;  %v720_v22 = vld [vmem:[#allocation13 + $0x268] sm:$0xff]  ;;  %v702_v43 = vld [vmem:[#allocation13 + $0x1d8] sm:$0xff] }
  0x84   : > { %843 = vmatpush.msrb.mxu1 %v760_v48  ;;  %v1403_v23 = vld [vmem:[%s2093_s4] ss:$0 sm:$0xff]  ;;  %812 = vmatpush.msra.mxu3 %v723_v17  ;;  %v651_v24 = vld [vmem:[#allocation13 + $0x40] sm:$0xff]  ;;  %v766_v48 = vld [vmem:[#allocation13 + $0x3d8] sm:$0xff] }
  0x85   : > { %824 = vmatpush.msrb.mxu0 %v692_v47  ;;  %v652_v25 = vld [vmem:[#allocation13 + $0x48] sm:$0xff]  ;;  %793 = vmatpush.msra.mxu2 %v655_v19  ;;  %v715_v26 = vld [vmem:[#allocation13 + $0x240] sm:$0xff]  ;;  %v698_v47 = vld [vmem:[#allocation13 + $0x1b8] sm:$0xff] }
  0x86   : > { %844 = vmatpush.msrb.mxu1 %v756_v50  ;;  %v716_v27 = vld [vmem:[#allocation13 + $0x248] sm:$0xff]  ;;  %813 = vmatpush.msra.mxu3 %v719_v21  ;;  %v647_v28 = vld [vmem:[#allocation13 + $0x20] sm:$0xff]  ;;  %v761_v50 = vld [vmem:[#allocation13 + $0x3b0] sm:$0xff] }
  0x87   : > { %825 = vmatpush.msrb.mxu0 %v688_v52  ;;  %v648_v29 = vld [vmem:[#allocation13 + $0x28] sm:$0xff]  ;;  %794 = vmatpush.msra.mxu2 %v651_v24  ;;  %v711_v31 = vld [vmem:[#allocation13 + $0x220] sm:$0xff]  ;;  %v762_v52 = vld [vmem:[#allocation13 + $0x3b8] sm:$0xff] }
  0x88   : > { %845 = vmatpush.msrb.mxu1 %v752_v54  ;;  %v712_v32 = vld [vmem:[#allocation13 + $0x228] sm:$0xff]  ;;  %814 = vmatpush.msra.mxu3 %v715_v26  ;;  %v643_v34 = vld [vmem:[#allocation13] sm:$0xff]  ;;  %v757_v54 = vld [vmem:[#allocation13 + $0x390] sm:$0xff] }
  0x89   : > { %826 = vmatpush.msrb.mxu0 %v684_v56  ;;  %v644_v35 = vld [vmem:[#allocation13 + $0x8] sm:$0xff]  ;;  %795 = vmatpush.msra.mxu2 %v647_v28  ;;  %v707_v39 = vld [vmem:[#allocation13 + $0x200] sm:$0xff]  ;;  %v758_v56 = vld [vmem:[#allocation13 + $0x398] sm:$0xff] }
  0x8a   : > { %846 = vmatpush.msrb.mxu1 %v748_v58  ;;  %815 = vmatpush.msra.mxu3 %v711_v31  ;;  %v708_v40 = vld [vmem:[#allocation13 + $0x208] sm:$0xff]  ;;  %v753_v58 = vld [vmem:[#allocation13 + $0x370] sm:$0xff]  ;;  %v670_v11 = vld [vmem:[#allocation13 + $0xd8] sm:$0xff] }
  0x8b   : > { %827 = vmatpush.msrb.mxu0 %v680_v60  ;;  %796 = vmatpush.msra.mxu2 %v643_v34  ;;  %v754_v60 = vld [vmem:[#allocation13 + $0x378] sm:$0xff]  ;;  %v665_v13 = vld [vmem:[#allocation13 + $0xb0] sm:$0xff] }
  0x8c   : > { %847 = vmatpush.msrb.mxu1 %v744_v62  ;;  %816 = vmatpush.msra.mxu3 %v707_v39  ;;  %v749_v62 = vld [vmem:[#allocation13 + $0x350] sm:$0xff]  ;;  %v666_v15 = vld [vmem:[#allocation13 + $0xb8] sm:$0xff] }
  0x8d   : > { %828 = vmatpush.msrb.mxu0 %v676_v0  ;;  %861 = vmatpush.msrb.mxu2 %v705_v36  ;;  %v750_v0 = vld [vmem:[#allocation13 + $0x358] sm:$0xff]  ;;  %v661_v17 = vld [vmem:[#allocation13 + $0x90] sm:$0xff] }
  0x8e   : > { %848 = vmatpush.msrb.mxu1 %v740_v2  ;;  %881 = vmatpush.msrb.mxu3 %v769_v42  ;;  %v745_v2 = vld [vmem:[#allocation13 + $0x330] sm:$0xff]  ;;  %v662_v19 = vld [vmem:[#allocation13 + $0x98] sm:$0xff] }
  0x8f   : > { %829 = vmatpush.msrb.mxu0 %v672_v4  ;;  %862 = vmatpush.msrb.mxu2 %v701_v41  ;;  %v746_v4 = vld [vmem:[#allocation13 + $0x338] sm:$0xff]  ;;  %v657_v21 = vld [vmem:[#allocation13 + $0x70] sm:$0xff] }
  0x90   : > { %849 = vmatpush.msrb.mxu1 %v736_v6  ;;  %882 = vmatpush.msrb.mxu3 %v765_v46  ;;  %v741_v6 = vld [vmem:[#allocation13 + $0x310] sm:$0xff]  ;;  %v726_v24 = vld [vmem:[#allocation13 + $0x298] sm:$0xff]  ;;  %v1020_v46 = vld [vmem:[#allocation15 + $0x68] sm:$0xff] }
  0x91   : > { %830 = vmatpush.msrb.mxu0 %v668_v8  ;;  %863 = vmatpush.msrb.mxu2 %v697_v45  ;;  %v742_v8 = vld [vmem:[#allocation13 + $0x318] sm:$0xff]  ;;  %v653_v26 = vld [vmem:[#allocation13 + $0x50] sm:$0xff] }
  0x92   : > { %850 = vmatpush.msrb.mxu1 %v732_v10  ;;  %883 = vmatpush.msrb.mxu3 %v761_v50  ;;  %v737_v10 = vld [vmem:[#allocation13 + $0x2f0] sm:$0xff]  ;;  %v654_v28 = vld [vmem:[#allocation13 + $0x58] sm:$0xff] }
  0x93   : > { %831 = vmatpush.msrb.mxu0 %v664_v12  ;;  %864 = vmatpush.msrb.mxu2 %v693_v49  ;;  %v738_v12 = vld [vmem:[#allocation13 + $0x2f8] sm:$0xff]  ;;  %v717_v31 = vld [vmem:[#allocation13 + $0x250] sm:$0xff] }
  0x94   : > { %851 = vmatpush.msrb.mxu1 %v728_v14  ;;  %884 = vmatpush.msrb.mxu3 %v757_v54  ;;  %v733_v14 = vld [vmem:[#allocation13 + $0x2d0] sm:$0xff]  ;;  %v646_v36 = vld [vmem:[#allocation13 + $0x18] sm:$0xff] }
  0x95   : > { %832 = vmatpush.msrb.mxu0 %v660_v16  ;;  %865 = vmatpush.msrb.mxu2 %v689_v53  ;;  %v734_v16 = vld [vmem:[#allocation13 + $0x2d8] sm:$0xff]  ;;  %v645_v34 = vld [vmem:[#allocation13 + $0x10] sm:$0xff] }
  0x96   : > { %852 = vmatpush.msrb.mxu1 %v724_v18  ;;  %885 = vmatpush.msrb.mxu3 %v753_v58  ;;  %v729_v18 = vld [vmem:[#allocation13 + $0x2b0] sm:$0xff]  ;;  %v710_v39 = vld [vmem:[#allocation13 + $0x218] sm:$0xff]  ;;  %v1015_v58 = vld [vmem:[#allocation15 + $0x40] sm:$0xff] }
  0x97   : > { %833 = vmatpush.msrb.mxu0 %v656_v20  ;;  %866 = vmatpush.msrb.mxu2 %v685_v57  ;;  %v730_v20 = vld [vmem:[#allocation13 + $0x2b8] sm:$0xff]  ;;  %v1021_v45 = vld [vmem:[#allocation15 + $0x70] sm:$0xff] }
  0x98   : > { %853 = vmatpush.msrb.mxu1 %v720_v22  ;;  %886 = vmatpush.msrb.mxu3 %v749_v62  ;;  %v725_v22 = vld [vmem:[#allocation13 + $0x290] sm:$0xff]  ;;  %v1018_v50 = vld [vmem:[#allocation15 + $0x58] sm:$0xff] }
  0x99   : > { %834 = vmatpush.msrb.mxu0 %v652_v25  ;;  %867 = vmatpush.msrb.mxu2 %v681_v61  ;;  %v642_v25 = vld [vmem:[#allocation2 + $0x8] sm:$0xff]  ;;  %v1014_v61 = vld [vmem:[#allocation15 + $0x38] sm:$0xff] }
  0x9a   : > { %854 = vmatpush.msrb.mxu1 %v716_v27  ;;  %887 = vmatpush.msrb.mxu3 %v745_v2  ;;  %v721_v27 = vld [vmem:[#allocation13 + $0x270] sm:$0xff] }
  0x9b   : > { %835 = vmatpush.msrb.mxu0 %v648_v29  ;;  %868 = vmatpush.msrb.mxu2 %v677_v1  ;;  %v722_v29 = vld [vmem:[#allocation13 + $0x278] sm:$0xff]  ;;  %v1013_v1 = vld [vmem:[#allocation15 + $0x30] sm:$0xff] }
  0x9c   : > { %855 = vmatpush.msrb.mxu1 %v712_v32  ;;  %888 = vmatpush.msrb.mxu3 %v741_v6  ;;  %v650_v32 = vld [vmem:[#allocation13 + $0x38] sm:$0xff]  ;;  %v1012_v6 = vld [vmem:[#allocation15 + $0x28] sm:$0xff] }
  0x9d   : > { %836 = vmatpush.msrb.mxu0 %v644_v35  ;;  %869 = vmatpush.msrb.mxu2 %v673_v5  ;;  %v713_v35 = vld [vmem:[#allocation13 + $0x230] sm:$0xff] }
  0x9e   : > { %856 = vmatpush.msrb.mxu1 %v708_v40  ;;  %889 = vmatpush.msrb.mxu3 %v737_v10  ;;  %v1404_v40 = vld [vmem:[%s2095_s6] ss:$0 sm:$0xff]  ;;  %v1010_v10 = vld [vmem:[#allocation15 + $0x18] sm:$0xff] }
  0x9f   : > { %901 = vmatpush.msra.mxu0 %v706_v38  ;;  %870 = vmatpush.msrb.mxu2 %v669_v9  ;;  %v709_v38 = vld [vmem:[#allocation13 + $0x210] sm:$0xff]  ;;  %v1011_v9 = vld [vmem:[#allocation15 + $0x20] sm:$0xff] }
  0xa0   : > { %890 = vmatpush.msrb.mxu3 %v733_v14 }
  0xa1   : > { %902 = vmatpush.msra.mxu0 %v702_v43  ;;  %871 = vmatpush.msrb.mxu2 %v665_v13  ;;  %v1009_v13 = vld [vmem:[#allocation15 + $0x10] sm:$0xff] }
  0xa2   : > { %891 = vmatpush.msrb.mxu3 %v729_v18 }
  0xa3   : > { %903 = vmatpush.msra.mxu0 %v698_v47  ;;  %872 = vmatpush.msrb.mxu2 %v661_v17  ;;  %v2031_v47 = vld [vmem:[%s2097_s8] sm:$0xf] }
  0xa4   : > { %892 = vmatpush.msrb.mxu3 %v725_v22  ;;  %v774_v49 = vperm.slane %v2031_v47, 1  ;;  %v773_v57 = vperm.slane %v2031_v47, 0 }
  0xa5   : > { %904 = vmatpush.msra.mxu0 %v694_v51  ;;  %873 = vmatpush.msrb.mxu2 %v657_v21 }
  0xa6   : > { %817 = vmatmul.f32.vlgmr.msra.gmra.mxu3 %v642_v25 }
  0xa7   : > { %905 = vmatpush.msra.mxu0 %v690_v55  ;;  %874 = vmatpush.msrb.mxu2 %v653_v26  ;;  %v1016_v55 = vld [vmem:[#allocation15 + $0x48] sm:$0xff] }
  0xa8   : > { %893 = vmatpush.msrb.mxu3 %v721_v27 }
  0xa9   : > { %906 = vmatpush.msra.mxu0 %v686_v59 }
  0xaa   : > { %894 = vmatpush.msrb.mxu3 %v717_v31 }
  0xab   : > { %907 = vmatpush.msra.mxu0 %v682_v63 }
  0xac   : > { %895 = vmatpush.msrb.mxu3 %v713_v35 }
  0xad   : > { %908 = vmatpush.msra.mxu0 %v678_v3 }
  0xae   : > { %896 = vmatpush.msrb.mxu3 %v709_v38 }
  0xaf   : > { %909 = vmatpush.msra.mxu0 %v674_v7  ;;  %897 = vmatmul.f32.vlgmr.msrb.gmra.mxu3 %v642_v25 }
  0xb1   : > { %910 = vmatpush.msra.mxu0 %v670_v11 }
  0xb3   : > { %911 = vmatpush.msra.mxu0 %v666_v15  ;;  %v1008_v15 = vld [vmem:[#allocation15 + $0x8] sm:$0xff] }
  0xb5   : > { %912 = vmatpush.msra.mxu0 %v662_v19  ;;  %v775_v19 = vperm.slane %v2031_v47, 2 }
  0xfb   : > { %v595_v30 = vpop.f32.mrf.mxu0 }
  0xfc   : > { %v596_v33 = vadd.f32 %v1403_v23, %v595_v30  ;;  %v658_v23 = vld [vmem:[#allocation13 + $0x78] sm:$0xff]  ;;  %v649_v30 = vld [vmem:[#allocation13 + $0x30] sm:$0xff] }
  0xfd   : > { %913 = vmatpush.msra.mxu0 %v658_v23  ;;  %875 = vmatpush.msrb.mxu2 %v649_v30 }
  0xfe   : > { %v598_v37 = vmax.f32 %v596_v33, 0.0  ;;  %v718_v33 = vld [vmem:[#allocation13 + $0x258] sm:$0xff] }
  0xff   : > { %914 = vmatpush.msra.mxu0 %v654_v28  ;;  %876 = vmatpush.msrb.mxu2 %v645_v34 }
 0x100   : > { %635 = vmatmul.f32.vlgmr.msra.gmra.mxu1 %v598_v37  ;;  %v714_v37 = vld [vmem:[#allocation13 + $0x238] sm:$0xff] }
 0x101   : > { %921 = vmatpush.msra.mxu1 %v770_v44  ;;  %915 = vmatpush.msra.mxu0 %v650_v32  ;;  %v1022_v44 = vld [vmem:[#allocation15 + $0x78] sm:$0xff] }
 0x103   : > { %922 = vmatpush.msra.mxu1 %v766_v48  ;;  %916 = vmatpush.msra.mxu0 %v646_v36  ;;  %v1019_v48 = vld [vmem:[#allocation15 + $0x60] sm:$0xff] }
 0x105   : > { %923 = vmatpush.msra.mxu1 %v762_v52  ;;  %v1017_v52 = vld [vmem:[#allocation15 + $0x50] sm:$0xff] }
 0x107   : > { %924 = vmatpush.msra.mxu1 %v758_v56 }
 0x108   : > { %857 = vmatmul.f32.vlgmr.msrb.gmra.mxu1 %v642_v25 }
 0x109   : > { %925 = vmatpush.msra.mxu1 %v754_v60  ;;  %v776_v60 = vperm.slane %v2031_v47, 3  ;;  %v999_v47 = vld [vmem:[#allocation3] sm:$0xff] }
 0x10b   : > { %926 = vmatpush.msra.mxu1 %v750_v0 }
 0x10d   : > { %927 = vmatpush.msra.mxu1 %v746_v4 }
 0x10f   : > { %928 = vmatpush.msra.mxu1 %v742_v8 }
 0x111   : > { %929 = vmatpush.msra.mxu1 %v738_v12 }
 0x113   : > { %930 = vmatpush.msra.mxu1 %v734_v16  ;;  %v1007_v16 = vld [vmem:[#allocation15] sm:$0xff] }
 0x115   : > { %931 = vmatpush.msra.mxu1 %v730_v20 }
 0x117   : > { %932 = vmatpush.msra.mxu1 %v726_v24 }
 0x119   : > { %933 = vmatpush.msra.mxu1 %v722_v29 }
 0x11b   : > { %934 = vmatpush.msra.mxu1 %v718_v33 }
 0x11d   : > { %935 = vmatpush.msra.mxu1 %v714_v37 }
 0x11f   : > { %936 = vmatpush.msra.mxu1 %v710_v39 }
 0x120   : > { %937 = vmatmul.f32.vlgmr.msra.gmra.mxu1 %v642_v25 }
 0x129   : > { %v818_v63 = vpop.f32.mrf.mxu3 }
 0x132   : > { %v898_v27 = vpop.f32.mrf.mxu3 }
 0x17d   : > { %v636_v41 = vpop.f32.mrf.mxu1 }
 0x17e   : > { %v637_v42 = vadd.f32 %v1404_v40, %v636_v41 }
 0x180   : > { %v639_v43 = vmax.f32 %v637_v42, 0.0 }
 0x182   : > { %797 = vmatmul.f32.vlgmr.msra.gmra.mxu2 %v639_v43  ;;  %837 = vmatmul.f32.vlgmr.msrb.gmra.mxu0 %v639_v43 }
 0x183   : > { %1027 = vmatpush.msra.mxu2 %v1022_v44 }
 0x185   : > { %1028 = vmatpush.msra.mxu2 %v1021_v45  ;;  %v858_v51 = vpop.f32.mrf.mxu1 }
 0x187   : > { %1029 = vmatpush.msra.mxu2 %v1020_v46 }
 0x189   : > { %1030 = vmatpush.msra.mxu2 %v1019_v48 }
 0x18a   : > { %877 = vmatmul.f32.vlgmr.msrb.gmra.mxu2 %v639_v43  ;;  %917 = vmatmul.f32.vlgmr.msra.gmra.mxu0 %v639_v43 }
 0x18b   : > { %1031 = vmatpush.msra.mxu2 %v1018_v50 }
 0x18d   : > { %1032 = vmatpush.msra.mxu2 %v1017_v52 }
 0x18f   : > { %1033 = vmatpush.msra.mxu2 %v1016_v55 }
 0x191   : > { %1034 = vmatpush.msra.mxu2 %v1015_v58 }
 0x193   : > { %1035 = vmatpush.msra.mxu2 %v1014_v61 }
 0x195   : > { %1036 = vmatpush.msra.mxu2 %v1013_v1 }
 0x197   : > { %1037 = vmatpush.msra.mxu2 %v1012_v6 }
 0x199   : > { %1038 = vmatpush.msra.mxu2 %v1011_v9 }
 0x19b   : > { %1039 = vmatpush.msra.mxu2 %v1010_v10 }
 0x19d   : > { %v938_v3 = vpop.f32.mrf.mxu1  ;;  %1040 = vmatpush.msra.mxu2 %v1009_v13 }
 0x19f   : > { %1041 = vmatpush.msra.mxu2 %v1008_v15 }
 0x1a1   : > { %1042 = vmatpush.msra.mxu2 %v1007_v16 }
 0x1ff   : > { %v838_v53 = vpop.f32.mrf.mxu0 }
 0x200   : > { %v839_v54 = vadd.f32 %v838_v53, %v774_v49 }
 0x202   : > { %v859_v56 = vadd.f32 %v858_v51, %v839_v54 }
 0x204   : > { %v1267_v59 = vmul.f32 -1.442695, %v859_v56 }
 0x205   : > { %v798_v62 = vpop.f32.mrf.mxu2 }
 0x206   : > { %1406 = vpow2.f32 %v1267_v59  ;;  %v799_v0 = vadd.f32 %v798_v62, %v773_v57 }
 0x207   : > { %v918_v2 = vpop.f32.mrf.mxu0 }
 0x208   : > { %v819_v4 = vadd.f32 %v818_v63, %v799_v0  ;;  %v919_v5 = vadd.f32 %v918_v2, %v776_v60  ;;  %v1405_v63 = vld [vmem:[%s2099_s10] ss:$0 sm:$0xff] }
 0x20a   : > { %v1266_v7 = vmul.f32 -1.442695, %v819_v4  ;;  %v939_v8 = vadd.f32 %v938_v3, %v919_v5 }
 0x20c   : > { %v1407_v11 = vpop.eup %1406  ;;  %1408 = vpow2.f32 %v1266_v7  ;;  %v1268_v12 = vmul.f32 -1.442695, %v939_v8 }
 0x20d   : > { %v963_v14 = vadd.f32 1.0, %v1407_v11  ;;  %v878_v21 = vpop.f32.mrf.mxu2 }
 0x20e   : > { %1410 = vpow2.f32 %v1268_v12  ;;  %v879_v25 = vadd.f32 %v878_v21, %v775_v19 }
 0x20f   : > { %1412 = vrcp.f32 %v963_v14  ;;  %v975_v34 = vand.u32 2147483648, %v963_v14  ;;  %vm969_vm1 = vweird.f32 %v963_v14  ;;  %v973_v37 = vand.u32 2147483647, %v963_v14 }
 0x210   : > { %v899_v30 = vadd.f32 %v898_v27, %v879_v25 }
 0x211   : > { %v976_v42 = vor.u32 1.1754944e-38, %v975_v34  ;;  %vm974_vm5 = vcmp.eq.f32.partialorder %v973_v37, 8.507059e+37 }
 0x212   : > { %v1409_v17 = vpop.eup %1408 }
 0x213   : > { %v944_v18 = vadd.f32 1.0, %v1409_v17 }
 0x214   : > { %v1411_v20 = vpop.eup %1410 }
 0x215   : > { %v1413_v22 = vpop.eup %1412  ;;  %1414 = vrcp.f32 %v944_v18  ;;  %v983_v23 = vadd.f32 1.0, %v1411_v20  ;;  %v956_v38 = vand.u32 2147483648, %v944_v18  ;;  %v954_v40 = vand.u32 2147483647, %v944_v18 }
 0x216   : > { %v965_v24 = vmul.f32 %v1413_v22, %v963_v14  ;;  %vm970_vm0 = vweird.f32 %v1413_v22  ;;  %vm950_vm4 = vweird.f32 %v944_v18 }
 0x217   : > { %1416 = vrcp.f32 %v983_v23  ;;  %vm971_vm2 = vmor %vm969_vm1, %vm970_vm0  ;;  %v957_v45 = vor.u32 1.1754944e-38, %v956_v38  ;;  %vm955_vm7 = vcmp.eq.f32.partialorder %v954_v40, 8.507059e+37  ;;  %v995_v56 = vand.u32 2147483648, %v983_v23 }
 0x218   : > { %v966_v26 = vsub.f32 1.0, %v965_v24  ;;  %1418 = vtanh.f32 %v899_v30  ;;  %vm989_vm9 = vweird.f32 %v983_v23  ;;  %v993_v57 = vand.u32 2147483647, %v983_v23 }
 0x219   : > { %v996_v59 = vor.u32 1.1754944e-38, %v995_v56 }
 0x21a   : > { %v967_v28 = vmul.f32 %v1413_v22, %v966_v26  ;;  %vm994_vm11 = vcmp.eq.f32.partialorder %v993_v57, 8.507059e+37 }
 0x21b   : > { %v1415_v29 = vpop.eup %1414 }
 0x21c   : > { %v946_v31 = vmul.f32 %v1415_v29, %v944_v18  ;;  %v968_v32 = vadd.f32 %v1413_v22, %v967_v28  ;;  %vm951_vm3 = vweird.f32 %v1415_v29 }
 0x21d   : > { %v1417_v33 = vpop.eup %1416  ;;  %vm952_vm6 = vmor %vm950_vm4, %vm951_vm3 }
 0x21e   : > { %v947_v35 = vsub.f32 1.0, %v946_v31  ;;  %v985_v36 = vmul.f32 %v1417_v33, %v983_v23  ;;  %v972_v41 = vsel %vm971_vm2, %v1413_v22, %v968_v32  ;;  %v1419_v49 = vpop.eup %1418  ;;  %vm990_vm8 = vweird.f32 %v1417_v33 }
 0x21f   : > { %v977_v46 = vsel %vm974_vm5, %v976_v42, %v972_v41  ;;  %vm991_vm10 = vmor %vm989_vm9, %vm990_vm8 }
 0x220   : > { %v948_v39 = vmul.f32 %v1415_v29, %v947_v35  ;;  %v986_v43 = vsub.f32 1.0, %v985_v36  ;;  %v1000_v52 = vmul.f32 %v999_v47, %v977_v46 }
 0x222   : > { %v949_v44 = vadd.f32 %v1415_v29, %v948_v39  ;;  %v987_v51 = vmul.f32 %v1417_v33, %v986_v43 }
 0x224   : > { %v953_v48 = vsel %vm952_vm6, %v1415_v29, %v949_v44  ;;  %v988_v55 = vadd.f32 %v1417_v33, %v987_v51 }
 0x225   : > { %v958_v50 = vsel %vm955_vm7, %v957_v45, %v953_v48 }
 0x226   : > { %v1001_v53 = vmul.f32 %v1419_v49, %v958_v50  ;;  %v992_v58 = vsel %vm991_vm10, %v1417_v33, %v988_v55 }
 0x227   : > { %v997_v61 = vsel %vm994_vm11, %v996_v59, %v992_v58 }
 0x228   : > { %v1002_v54 = vadd.f32 %v1001_v53, %v1000_v52 }
 0x22a   : > { %1420 = vtanh.f32 %v1002_v54  ;;  %1005 = vst [vmem:[#allocation3] sm:$0xff] %v1002_v54 }
 0x230   : > { %v1421_v60 = vpop.eup %1420 }
 0x231   : > { %v1004_v62 = vmul.f32 %v1421_v60, %v997_v61 }
 0x233   : > { %1006 = vst [vmem:[#allocation2 + $0x8] sm:$0xff] %v1004_v62  ;;  %1043 = vmatmul.f32.vlgmr.msra.gmra.mxu2 %v1004_v62 }
 0x2b6   : > { %v1044_v0 = vpop.f32.mrf.mxu2 }
 0x2b7   : > { %v1045_v1 = vadd.f32 %v1405_v63, %v1044_v0 }
 0x2b9   : > { %1422 = vtanh.f32 %v1045_v1 }
 0x2bc   : > { %1052 = sbr.rel (%p1269_p1) target bundleno = 707 (0x2c3), region = 100 }
 0x2bf   : > { %v1423_v2 = vpop.eup %1422 }
 0x2c0   : > { %1048 = vst [vmem:[%s2017_s2] sm:$0xff] %v1423_v2 }
 0x2c1   : > { %1053 = vst [vmem:[#allocation17] sm:$0xff] %v1004_v62 }
 0x2c2   : > { %1054 = vst [vmem:[#allocation19] sm:$0xff] %v1002_v54 }
 0x2c3 PF: > { %s1082_s22 = sshll.u32 %s2101_s12, 4  ;;  %s1784_s18 = smov [#allocation17]   ;;  %s1083_s22 = int_to_ptr.hbm [resolvable:$true] %s1082_s22 }
 0x2c4   : > { %s1080_s17 = sshll.u32 %s1784_s18, 4  ;;  %p2129_p4 = scmp.eq.s32.totalorder %s1880_s15, 7  ;;  %s1081_s17 = int_to_ptr.vmem [resolvable:$true] %s1080_s17 }
 0x2c5   : > { %s1271_s3 = sshll.u32 %s1880_s15, 3  ;;  %s1068_s5 = sshll.u32 %s2017_s2, 4  ;;  %s1069_s5 = int_to_ptr.vmem [resolvable:$true] %s1068_s5 }
 0x2c6   : > { %1306 = dma.vmem_to_hbm [thread:$0]  (%p2129_p4), %s1081_s17, 128, %s1083_s22, [#allocation18]  }
 0x2c7   : > { %s2130_s16 = sld [smem:[#allocation33_spill]]  ;;  %s1785_s21 = smov [#allocation19]  }
 0x2c8   : > { %s1092_s11 = sshll.u32 %s1785_s21, 4  ;;  %s1056_s20 = scalar_lea.sflag [#allocation6], %s1995_s30  ;;  %s1093_s11 = int_to_ptr.vmem [resolvable:$true] %s1092_s11 }
 0x2cd   : > { %s1066_s29 = scalar_lea.hbm %s2130_s16, %s1271_s3  ;;  %s1682_s2 = scalar_lea.hbm %s2130_s16, 64 }
 0x2ce   : > { %s1070_s19 = sshll.u32 %s1066_s29, 4  ;;  %s1071_s19 = int_to_ptr.hbm [resolvable:$true] %s1070_s19 }
 0x2cf   : > { %s1676_s14 = sshra.s32 %s1071_s19, 4  ;;  %s1677_s14 = int_to_ptr.hbm [resolvable:$true] %s1676_s14 }
 0x2d0   : > { %s1678_s18 = scalar_lea.hbm %s1677_s14, 8  ;;  %p1683_p8 = scmp.lt.s32.totalorder %s1677_s14, %s2130_s16 }
 0x2d1   : > { %p1679_p12 = scmp.ne.s32.totalorder %s1677_s14, %s1678_s18  ;;  %p1684_p9 = scmp.lt.s32.totalorder %s1682_s2, %s1678_s18 }
 0x2d3   : > { %p1680_p13 = pnand %p1679_p12, %p1964_p5  ;;  %p1685_p10 = por %p1684_p9, %p1683_p8 }
 0x2d5   : > { %p1681_p7 = pneg %p1680_p13 }
 0x2d7   : > { %p1686_p0 = pnand %p1685_p10, %p1681_p7 }
 0x2d9   : > { %1689 = shalt.err (!%p1686_p0)
}
 0x2da   : > { %1304 = dma.vmem_to_hbm [thread:$0]  (%p1964_p5), %s1069_s5, 128, %s1071_s19, %s1056_s20  }
 0x2db   : > { %s2131_s9 = sld [smem:[#allocation34_spill]]  ;;  %p2132_p11 = pmov %p2129_p4 }
 0x2dc   : > { %p2133_p2 = pmov %p2129_p4 }
 0x2e1   : > { %s1094_s29 = sshll.u32 %s2131_s9, 4  ;;  %s1095_s29 = int_to_ptr.hbm [resolvable:$true] %s1094_s29 }
 0x2e2   : > { %1308 = dma.vmem_to_hbm [thread:$0]  (%p2132_p11), %s1093_s11, 128, %s1095_s29, [#allocation18]  }
 0x2e3   : > { %1751 = dma.done.wait (%p2133_p2), [#allocation18], 256   ;;  %p2134_p3 = pmov %p2133_p2 }
 0x2e5   : > { %1753 = vsyncadd (%p2134_p3), [#allocation18], 4294967040 }
 0x2e6 PF: > { %p1358_p1 = scmp.ge.s32.totalorder %s1772_s28, 2  ;;  %s1116_s0 = sand.u32 1, %s1760_s25  }
 0x2e7   : > { %s1117_s13 = scalar_lea.sflag [#allocation6], %s1116_s0 }
 0x2e8   : > { %p1338_p5 = pnand %p1358_p1, %p1968_p6 }
 0x2ea   : > { %p1339_p4 = pneg %p1338_p5 }
 0x2ec   : > { %1755 = dma.done.wait (%p1339_p4), %s1117_s13, 128  }
 0x2ed   : > { %1757 = vsyncadd (%p1339_p4), %s1117_s13, 4294967168  ;;  %p31_p12 = scmp.ge.s32.totalorder %s1936_s24, 10   ;;  %s2135_s25 = smov %s1764_s26 }
 0x2ee   : > { %s2136_s26 = smov %s1768_s27  ;;  %s2137_s27 = smov %s1947_s1 }
 0x2ef   : > { %s2138_s28 = smov %s1936_s24  ;;  %33 = sbr.rel (!%p31_p12) target bundleno = 19 (0x13), region = 157 }
 0x2f4   :  { %1123 = vsyncpa [#allocation5], 1 }
 0x2f5   :  { %1125 = vsyncpa [#allocation5 + $0x1], 1 }
 0x2f6   :  { %1126 = vsyncpa [#allocation8], 1 }
 0x2f7   :  { %1127 = vsyncpa [#allocation11], 1 }
 0x2f8   :  { %1128 = vsyncpa [#allocation14], 1 }
 0x2f9   :  { %1129 = vsyncpa [#allocation6], 1 }
 0x2fa   :  { %1131 = vsyncpa [#allocation6 + $0x1], 1 }
 0x2fb   :  { %1132 = vsyncpa [#allocation18], 1 }

</bundles_post_ra>
